<compile_context>
chip_gen: v7x
topology: tpu7x:2x2x1
jax: 0.10.0
libtpu: 0.0.40
codegen_flags: <defaults>
</compile_context>

<pallas_src>
import jax
import jax.numpy as jnp
from jax.experimental import pallas as pl
from jax.experimental.pallas import tpu as pltpu

NUM_LABELS = 2     # `num_labels` is a module-level global in the reference script.
HIDDEN = 128


def _round_up(x, m):
    return ((x + m - 1) // m) * m


def _cdiv(x, m):
    return (x + m - 1) // m


def _vmem_capacity_bytes():
    """Per-core VMEM capacity (generation aware); conservative 64 MiB fallback."""
    try:
        cap = getattr(pltpu.get_tpu_info(), "vmem_capacity_bytes", None)
        if cap:
            return int(cap)
    except Exception:
        pass
    return 64 << 20


def _log_softmax_rows(o):
    """Row-wise log_softmax; closed form for 2 classes (full-lane, no width-1 slices)."""
    m = jnp.max(o, axis=-1, keepdims=True)
    if o.shape[-1] == 2:
        # For two classes: min = sum - max  =>  lse = max + log(1 + exp(min - max)).
        d = jnp.sum(o, axis=-1, keepdims=True) - 2.0 * m
        lse = m + jnp.log(1.0 + jnp.exp(d))
    else:
        lse = m + jnp.log(jnp.sum(jnp.exp(o - m), axis=-1, keepdims=True))
    return o - lse


def _uncertainty_kernel(x_ref, w1_ref, b1_ref, w2_ref, b2_ref, out_ref):
    x = x_ref[...]
    w1 = w1_ref[...]
    if x.dtype != w1.dtype:
        # In-kernel cast (VPU slack): x HBM traffic stays one pass in the source
        # dtype; the MXU still accumulates in f32.
        x = x.astype(w1.dtype)
    h = jnp.dot(x, w1, preferred_element_type=jnp.float32) + b1_ref[...]
    h = jnp.maximum(h, 0.0)                                       # Linear1 + clamp(min=0)
    o = jnp.dot(h, w2_ref[...], preferred_element_type=jnp.float32) + b2_ref[...]
    out_ref[...] = _log_softmax_rows(o)


def _uncertainty_kernel_ksplit(x_ref, w1_ref, b1_ref, w2_ref, b2_ref, out_ref, h_acc):
    k = pl.program_id(1)

    @pl.when(k == 0)
    def _():
        h_acc[...] = jnp.zeros_like(h_acc)

    x = x_ref[...]
    w1 = w1_ref[...]
    if x.dtype != w1.dtype:
        x = x.astype(w1.dtype)
    h_acc[...] += jnp.dot(x, w1, preferred_element_type=jnp.float32)

    @pl.when(k == pl.num_programs(1) - 1)
    def _():
        h = jnp.maximum(h_acc[...] + b1_ref[...], 0.0)
        o = jnp.dot(h, w2_ref[...], preferred_element_type=jnp.float32) + b2_ref[...]
        out_ref[...] = _log_softmax_rows(o)


def advanced_uncertainty_predictor(feature_vec, w1, b1, w2, b2, *,
                                   cast_bf16=True, force_v_tile=None):
    """feature_vec: [B, vocab_size]; w1: [vocab_size, 128] (pre-transposed);
    b1: [128]; w2: [128, num_labels] (pre-transposed); b2: [num_labels].
    Returns log_softmax [B, num_labels] float32."""
    B, V = feature_vec.shape
    H = w1.shape[1]
    L = w2.shape[1]

    # x keeps its source dtype (cast happens in-kernel); weights cast once here.
    x = feature_vec
    if x.dtype != jnp.float32 and x.dtype != jnp.bfloat16:
        x = x.astype(jnp.float32)
    w1c = w1.astype(jnp.bfloat16 if cast_bf16 else jnp.float32)
    w2c = w2.astype(jnp.float32)
    b1_2d = b1.reshape(1, H).astype(jnp.float32)
    b2_2d = b2.reshape(1, L).astype(jnp.float32)

    x_item = x.dtype.itemsize
    w1_item = w1c.dtype.itemsize
    align = 16 if x.dtype == jnp.bfloat16 else 8     # sublane alignment of the batch tile

    cap = _vmem_capacity_bytes()                     # 64 MiB on v7x, 128 MiB on v5e/v6e
    usable = int(cap * 0.8)                          # headroom for compiler scratch
    margin = 2 << 20

    # Small residents (b1, w2, b2); budget them double-buffered to be safe.
    small_resident = (H * L + H + L) * 4
    w1_resident = V * H * w1_item
    min_tile_bytes = 2 * align * V * x_item
    single_pass_fits = (w1_resident + 2 * small_resident + min_tile_bytes + margin) <= usable
    use_k_split = (force_v_tile is not None) or (not single_pass_fits)

    def _tb_from_budget(avail, per_row):
        tb = max(align, (avail // per_row) // align * align)
        tb = min(tb, _round_up(B, align))
        if B > align:
            # keep >= 2 grid steps so v7x's two TensorCores both get work
            tb = min(tb, _round_up(_cdiv(B, 2), align))
        return tb

    if not use_k_split:
        # ---------------- single-pass path: W1 resident in VMEM ----------------
        # per-row cost: double-buffered x tile + double-buffered out tile + f32 h/o temps
        per_row = 2 * V * x_item + 2 * L * 4 + (H + 3 * L) * 4
        tb = _tb_from_budget(usable - w1_resident - 2 * small_resident - margin, per_row)
        grid = (_cdiv(B, tb),)

        vmem_budget = 2 * w1_resident + 2 * small_resident + tb * per_row + margin
        vmem_limit = int(min(max(vmem_budget * 5 // 4, 32 << 20), cap - (4 << 20)))
        cost = pl.CostEstimate(
            flops=2 * B * V * H + 2 * B * H * L,
            transcendentals=B * L,
            bytes_accessed=B * V * x_item + V * H * w1_item + B * L * 4 + small_resident)

        def call(single_buffer_weights):
            def resident(shape):
                if single_buffer_weights:
                    return pl.BlockSpec(shape, lambda i: (0, 0),
                                        pipeline_mode=pl.Buffered(1))
                return pl.BlockSpec(shape, lambda i: (0, 0))

            return pl.pallas_call(
                _uncertainty_kernel,
                out_shape=jax.ShapeDtypeStruct((B, L), jnp.float32),
                grid=grid,
                in_specs=[
                    pl.BlockSpec((tb, V), lambda i: (i, 0)),   # x: new tile each step
                    resident((V, H)),                          # W1: resident
                    resident((1, H)),                          # b1
                    resident((H, L)),                          # W2
                    resident((1, L)),                          # b2
                ],
                out_specs=pl.BlockSpec((tb, L), lambda i: (i, 0)),
                compiler_params=pltpu.CompilerParams(
                    dimension_semantics=("parallel",),
                    vmem_limit_bytes=vmem_limit),
                cost_estimate=cost,
            )(x, w1c, b1_2d, w2c, b2_2d)

        try:
            return call(True)
        except Exception:
            return call(False)

    # ---------------- K-split path: huge vocab (or forced) ----------------
    if force_v_tile is not None:
        tv = int(force_v_tile)
    else:
        # Target roughly a third of usable VMEM for the double-buffered W1 tile.
        tv = max(128, ((usable // 3) // (2 * H * w1_item)) // 128 * 128)
    tv = min(tv, _round_up(V, 128))
    V_pad = _round_up(V, tv)
    if V_pad != V:
        # Zero-padding along vocab only in this large-vocab fallback; the padded
        # columns/rows contribute exactly 0 to the hidden accumulator.
        x = jnp.pad(x, ((0, 0), (0, V_pad - V)))
        w1c = jnp.pad(w1c, ((0, V_pad - V), (0, 0)))
    nk = V_pad // tv

    # per-row: double-buffered x tile + f32 h_acc scratch + out tile + temporaries
    per_row = 2 * tv * x_item + H * 4 + 2 * L * 4 + (H + 3 * L) * 4
    w_tiles = 2 * tv * H * w1_item + 2 * small_resident
    tb = _tb_from_budget(usable - w_tiles - margin, per_row)
    grid = (_cdiv(B, tb), nk)

    vmem_budget = w_tiles + tb * per_row + margin
    vmem_limit = int(min(max(vmem_budget * 5 // 4, 32 << 20), cap - (4 << 20)))
    cost = pl.CostEstimate(
        flops=2 * B * V_pad * H + 2 * B * H * L,
        transcendentals=B * L,
        bytes_accessed=B * V_pad * x_item + V_pad * H * w1_item + B * L * 4 + small_resident)

    def call_ks(single_buffer_weights):
        def resident(shape):
            if single_buffer_weights:
                return pl.BlockSpec(shape, lambda i, k: (0, 0),
                                    pipeline_mode=pl.Buffered(1))
            return pl.BlockSpec(shape, lambda i, k: (0, 0))

        return pl.pallas_call(
            _uncertainty_kernel_ksplit,
            out_shape=jax.ShapeDtypeStruct((B, L), jnp.float32),
            grid=grid,
            in_specs=[
                pl.BlockSpec((tb, tv), lambda i, k: (i, k)),   # x: batch x vocab tile
                pl.BlockSpec((tv, H), lambda i, k: (k, 0)),    # W1: vocab tile (double-buffered)
                resident((1, H)),                              # b1
                resident((H, L)),                              # W2
                resident((1, L)),                              # b2
            ],
            out_specs=pl.BlockSpec((tb, L), lambda i, k: (i, 0)),
            scratch_shapes=[pltpu.VMEM((tb, H), jnp.float32)],
            compiler_params=pltpu.CompilerParams(
                dimension_semantics=("parallel", "arbitrary"),
                vmem_limit_bytes=vmem_limit),
            cost_estimate=cost,
        )(x, w1c, b1_2d, w2c, b2_2d)

    try:
        return call_ks(True)
    except Exception:
        return call_ks(False)


def _ref_forward(x, w1, b1, w2, b2):
    h = jnp.maximum(x @ w1 + b1, 0.0)
    o = h @ w2 + b2
    return jax.nn.log_softmax(o, axis=1)


if __name__ == "__main__":
    key = jax.random.PRNGKey(0)
    k_x, k_w1, k_b1, k_w2, k_b2, k_x2, k_w1b = jax.random.split(key, 7)

    # Small shapes consistent with the module: Linear(vocab,128) -> Linear(128,num_labels).
    # batch=10 is deliberately NOT a tile multiple: exercises the masked last block.
    batch, vocab = 10, 256

    # PyTorch Linear default init: uniform(-1/sqrt(fan_in), 1/sqrt(fan_in)),
    # weights stored pre-transposed as [in_features, out_features].
    bound1 = 1.0 / (vocab ** 0.5)
    w1 = jax.random.uniform(k_w1, (vocab, HIDDEN), jnp.float32, -bound1, bound1)
    b1 = jax.random.uniform(k_b1, (HIDDEN,), jnp.float32, -bound1, bound1)
    bound2 = 1.0 / (HIDDEN ** 0.5)
    w2 = jax.random.uniform(k_w2, (HIDDEN, NUM_LABELS), jnp.float32, -bound2, bound2)
    b2 = jax.random.uniform(k_b2, (NUM_LABELS,), jnp.float32, -bound2, bound2)
    x = jax.random.uniform(k_x, (batch, vocab), jnp.float32)

    ref = _ref_forward(x, w1, b1, w2, b2)

    # Strict-semantics path (pure f32): must match the reference tightly.
    out_f32 = jax.block_until_ready(
        advanced_uncertainty_predictor(x, w1, b1, w2, b2, cast_bf16=False))
    assert out_f32.shape == (batch, NUM_LABELS)
    assert jnp.allclose(out_f32, ref, atol=1e-5, rtol=1e-5), "f32 mismatch vs reference"

    # Performance path (in-kernel bf16 cast for the first matmul, f32 accumulation).
    out_bf16 = jax.block_until_ready(
        advanced_uncertainty_predictor(x, w1, b1, w2, b2, cast_bf16=True))
    assert out_bf16.shape == (batch, NUM_LABELS)
    assert jnp.allclose(out_bf16, ref, atol=3e-2, rtol=3e-2), "bf16 mismatch vs reference"

    # K-split (large-vocab fallback) path, forced at small shapes so it stays tested.
    batch2, vocab2 = 16, 512
    bound1b = 1.0 / (vocab2 ** 0.5)
    w1b = jax.random.uniform(k_w1b, (vocab2, HIDDEN), jnp.float32, -bound1b, bound1b)
    x2 = jax.random.uniform(k_x2, (batch2, vocab2), jnp.float32)
    ref2 = _ref_forward(x2, w1b, b1, w2, b2)
    out_ks = jax.block_until_ready(
        advanced_uncertainty_predictor(x2, w1b, b1, w2, b2,
                                       cast_bf16=False, force_v_tile=128))
    assert out_ks.shape == (batch2, NUM_LABELS)
    assert jnp.allclose(out_ks, ref2, atol=1e-4, rtol=1e-4), "K-split mismatch vs reference"

    print("KERNEL_OK")
</pallas_src>

<mosaic_0001>
module attributes {stable_mosaic.version = 11 : i64} {
  func.func @_uncertainty_kernel(%arg0: i32, %arg1: memref<8x256xf32, #tpu.memory_space<vmem>>, %arg2: memref<256x128xf32, #tpu.memory_space<vmem>>, %arg3: memref<1x128xf32, #tpu.memory_space<vmem>>, %arg4: memref<128x2xf32, #tpu.memory_space<vmem>>, %arg5: memref<1x2xf32, #tpu.memory_space<vmem>>, %arg6: memref<8x2xf32, #tpu.memory_space<vmem>>) attributes {dimension_semantics = [#tpu.dimension_semantics<parallel>], iteration_bounds = array<i64: 2>, scalar_prefetch = 0 : i64, scratch_operands = 0 : i64, tpu.core_type = #tpu.core_type<tc>, window_params = [{transform_indices = @transform_0, window_bounds = array<i64: 8, 256>}, {pipeline_mode = #tpu.pipeline_mode<synchronous>, transform_indices = @transform_1, window_bounds = array<i64: 256, 128>}, {pipeline_mode = #tpu.pipeline_mode<synchronous>, transform_indices = @transform_2, window_bounds = array<i64: 1, 128>}, {pipeline_mode = #tpu.pipeline_mode<synchronous>, transform_indices = @transform_3, window_bounds = array<i64: 128, 2>}, {pipeline_mode = #tpu.pipeline_mode<synchronous>, transform_indices = @transform_4, window_bounds = array<i64: 1, 2>}, {transform_indices = @transform_5, window_bounds = array<i64: 8, 2>}]} {
    %c0 = arith.constant 0 : index
    %c0_0 = arith.constant 0 : index
    %0 = vector.load %arg1[%c0, %c0_0] : memref<8x256xf32, #tpu.memory_space<vmem>>, vector<8x256xf32>
    %c0_1 = arith.constant 0 : index
    %c0_2 = arith.constant 0 : index
    %1 = vector.load %arg2[%c0_1, %c0_2] : memref<256x128xf32, #tpu.memory_space<vmem>>, vector<256x128xf32>
    %cst = arith.constant dense<0.000000e+00> : vector<8x128xf32>
    %2 = tpu.matmul %0, %1, %cst {dimension_numbers = #tpu.dot_dimension_numbers<[1], [0], [0], [1], [0, 0, 1, 1], [], []>} : vector<8x256xf32>, vector<256x128xf32>, vector<8x128xf32> -> vector<8x128xf32>
    %c0_3 = arith.constant 0 : index
    %c0_4 = arith.constant 0 : index
    %3 = vector.load %arg3[%c0_3, %c0_4] : memref<1x128xf32, #tpu.memory_space<vmem>>, vector<1x128xf32>
    %4 = vector.broadcast %3 : vector<1x128xf32> to vector<8x128xf32>
    %5 = arith.addf %2, %4 : vector<8x128xf32>
    %cst_5 = arith.constant 0.000000e+00 : f32
    %6 = vector.broadcast %cst_5 : f32 to vector<8x128xf32>
    %7 = arith.maximumf %5, %6 : vector<8x128xf32>
    %c0_6 = arith.constant 0 : index
    %c0_7 = arith.constant 0 : index
    %8 = vector.load %arg4[%c0_6, %c0_7] : memref<128x2xf32, #tpu.memory_space<vmem>>, vector<128x2xf32>
    %cst_8 = arith.constant dense<0.000000e+00> : vector<8x2xf32>
    %9 = tpu.matmul %7, %8, %cst_8 {dimension_numbers = #tpu.dot_dimension_numbers<[1], [0], [0], [1], [0, 0, 1, 1], [], []>} : vector<8x128xf32>, vector<128x2xf32>, vector<8x2xf32> -> vector<8x2xf32>
    %c0_9 = arith.constant 0 : index
    %c0_10 = arith.constant 0 : index
    %10 = vector.load %arg5[%c0_9, %c0_10] : memref<1x2xf32, #tpu.memory_space<vmem>>, vector<1x2xf32>
    %11 = vector.broadcast %10 : vector<1x2xf32> to vector<8x2xf32>
    %12 = arith.addf %9, %11 : vector<8x2xf32>
    %cst_11 = arith.constant dense<0xFF800000> : vector<8xf32>
    %13 = vector.multi_reduction <maximumf>, %12, %cst_11 [1] : vector<8x2xf32> to vector<8xf32>
    %14 = vector.shape_cast %13 : vector<8xf32> to vector<8x1xf32>
    %cst_12 = arith.constant dense<0.000000e+00> : vector<8xf32>
    %15 = vector.multi_reduction <add>, %12, %cst_12 [1] : vector<8x2xf32> to vector<8xf32>
    %16 = vector.shape_cast %15 : vector<8xf32> to vector<8x1xf32>
    %cst_13 = arith.constant 2.000000e+00 : f32
    %17 = vector.broadcast %cst_13 : f32 to vector<8x1xf32>
    %18 = arith.mulf %17, %14 : vector<8x1xf32>
    %19 = arith.subf %16, %18 : vector<8x1xf32>
    %20 = math.exp %19 : vector<8x1xf32>
    %cst_14 = arith.constant 1.000000e+00 : f32
    %21 = vector.broadcast %cst_14 : f32 to vector<8x1xf32>
    %22 = arith.addf %21, %20 : vector<8x1xf32>
    %23 = math.log %22 : vector<8x1xf32>
    %24 = arith.addf %14, %23 : vector<8x1xf32>
    %25 = vector.broadcast %24 : vector<8x1xf32> to vector<8x2xf32>
    %26 = arith.subf %12, %25 : vector<8x2xf32>
    %c0_15 = arith.constant 0 : index
    %c0_16 = arith.constant 0 : index
    %27 = vector.load %arg6[%c0_15, %c0_16] : memref<8x2xf32, #tpu.memory_space<vmem>>, vector<8x2xf32>
    tpu.vector_store %arg6[%c0_15, %c0_16], %26 {strides = array<i32>} : memref<8x2xf32, #tpu.memory_space<vmem>>, vector<8x2xf32>,
    return
  }
  func.func @transform_0(%arg0: i32) -> (i32, i32) {
    %c0_i32 = arith.constant 0 : i32
    %c0_i32_0 = arith.constant 0 : i32
    return %arg0, %c0_i32 : i32, i32
  }
  func.func @transform_1(%arg0: i32) -> (i32, i32) {
    %c0_i32 = arith.constant 0 : i32
    %c0_i32_0 = arith.constant 0 : i32
    %c0_i32_1 = arith.constant 0 : i32
    return %c0_i32, %c0_i32_0 : i32, i32
  }
  func.func @transform_2(%arg0: i32) -> (i32, i32) {
    %c0_i32 = arith.constant 0 : i32
    %c0_i32_0 = arith.constant 0 : i32
    %c0_i32_1 = arith.constant 0 : i32
    return %c0_i32, %c0_i32_0 : i32, i32
  }
  func.func @transform_3(%arg0: i32) -> (i32, i32) {
    %c0_i32 = arith.constant 0 : i32
    %c0_i32_0 = arith.constant 0 : i32
    %c0_i32_1 = arith.constant 0 : i32
    return %c0_i32, %c0_i32_0 : i32, i32
  }
  func.func @transform_4(%arg0: i32) -> (i32, i32) {
    %c0_i32 = arith.constant 0 : i32
    %c0_i32_0 = arith.constant 0 : i32
    %c0_i32_1 = arith.constant 0 : i32
    return %c0_i32, %c0_i32_0 : i32, i32
  }
  func.func @transform_5(%arg0: i32) -> (i32, i32) {
    %c0_i32 = arith.constant 0 : i32
    %c0_i32_0 = arith.constant 0 : i32
    return %arg0, %c0_i32 : i32, i32
  }
}

module attributes {stable_mosaic.version = 11 : i64} {
  func.func @_uncertainty_kernel(%arg0: i32, %arg1: memref<8x256xf32, #tpu.memory_space<vmem>>, %arg2: memref<256x128xf32, #tpu.memory_space<vmem>>, %arg3: memref<1x128xf32, #tpu.memory_space<vmem>>, %arg4: memref<128x2xf32, #tpu.memory_space<vmem>>, %arg5: memref<1x2xf32, #tpu.memory_space<vmem>>, %arg6: memref<8x2xf32, #tpu.memory_space<vmem>>) attributes {dimension_semantics = [#tpu.dimension_semantics<parallel>], iteration_bounds = array<i64: 2>, scalar_prefetch = 0 : i64, scratch_operands = 0 : i64, tpu.core_type = #tpu.core_type<tc>, window_params = [{transform_indices = @transform_0, window_bounds = array<i64: 8, 256>}, {pipeline_mode = #tpu.pipeline_mode<synchronous>, transform_indices = @transform_1, window_bounds = array<i64: 256, 128>}, {pipeline_mode = #tpu.pipeline_mode<synchronous>, transform_indices = @transform_2, window_bounds = array<i64: 1, 128>}, {pipeline_mode = #tpu.pipeline_mode<synchronous>, transform_indices = @transform_3, window_bounds = array<i64: 128, 2>}, {pipeline_mode = #tpu.pipeline_mode<synchronous>, transform_indices = @transform_4, window_bounds = array<i64: 1, 2>}, {transform_indices = @transform_5, window_bounds = array<i64: 8, 2>}]} {
    %c0 = arith.constant 0 : index
    %c0_0 = arith.constant 0 : index
    %0 = vector.load %arg1[%c0, %c0_0] : memref<8x256xf32, #tpu.memory_space<vmem>>, vector<8x256xf32>
    %c0_1 = arith.constant 0 : index
    %c0_2 = arith.constant 0 : index
    %1 = vector.load %arg2[%c0_1, %c0_2] : memref<256x128xf32, #tpu.memory_space<vmem>>, vector<256x128xf32>
    %cst = arith.constant dense<0.000000e+00> : vector<8x128xf32>
    %2 = tpu.matmul %0, %1, %cst {dimension_numbers = #tpu.dot_dimension_numbers<[1], [0], [0], [1], [0, 0, 1, 1], [], []>} : vector<8x256xf32>, vector<256x128xf32>, vector<8x128xf32> -> vector<8x128xf32>
    %c0_3 = arith.constant 0 : index
    %c0_4 = arith.constant 0 : index
    %3 = vector.load %arg3[%c0_3, %c0_4] : memref<1x128xf32, #tpu.memory_space<vmem>>, vector<1x128xf32>
    %4 = vector.broadcast %3 : vector<1x128xf32> to vector<8x128xf32>
    %5 = arith.addf %2, %4 : vector<8x128xf32>
    %cst_5 = arith.constant 0.000000e+00 : f32
    %6 = vector.broadcast %cst_5 : f32 to vector<8x128xf32>
    %7 = arith.maximumf %5, %6 : vector<8x128xf32>
    %c0_6 = arith.constant 0 : index
    %c0_7 = arith.constant 0 : index
    %8 = vector.load %arg4[%c0_6, %c0_7] : memref<128x2xf32, #tpu.memory_space<vmem>>, vector<128x2xf32>
    %cst_8 = arith.constant dense<0.000000e+00> : vector<8x2xf32>
    %9 = tpu.matmul %7, %8, %cst_8 {dimension_numbers = #tpu.dot_dimension_numbers<[1], [0], [0], [1], [0, 0, 1, 1], [], []>} : vector<8x128xf32>, vector<128x2xf32>, vector<8x2xf32> -> vector<8x2xf32>
    %c0_9 = arith.constant 0 : index
    %c0_10 = arith.constant 0 : index
    %10 = vector.load %arg5[%c0_9, %c0_10] : memref<1x2xf32, #tpu.memory_space<vmem>>, vector<1x2xf32>
    %11 = vector.broadcast %10 : vector<1x2xf32> to vector<8x2xf32>
    %12 = arith.addf %9, %11 : vector<8x2xf32>
    %cst_11 = arith.constant dense<0xFF800000> : vector<8xf32>
    %13 = vector.multi_reduction <maximumf>, %12, %cst_11 [1] : vector<8x2xf32> to vector<8xf32>
    %14 = vector.shape_cast %13 : vector<8xf32> to vector<8x1xf32>
    %cst_12 = arith.constant dense<0.000000e+00> : vector<8xf32>
    %15 = vector.multi_reduction <add>, %12, %cst_12 [1] : vector<8x2xf32> to vector<8xf32>
    %16 = vector.shape_cast %15 : vector<8xf32> to vector<8x1xf32>
    %cst_13 = arith.constant 2.000000e+00 : f32
    %17 = vector.broadcast %cst_13 : f32 to vector<8x1xf32>
    %18 = arith.mulf %17, %14 : vector<8x1xf32>
    %19 = arith.subf %16, %18 : vector<8x1xf32>
    %20 = math.exp %19 : vector<8x1xf32>
    %cst_14 = arith.constant 1.000000e+00 : f32
    %21 = vector.broadcast %cst_14 : f32 to vector<8x1xf32>
    %22 = arith.addf %21, %20 : vector<8x1xf32>
    %23 = math.log %22 : vector<8x1xf32>
    %24 = arith.addf %14, %23 : vector<8x1xf32>
    %25 = vector.broadcast %24 : vector<8x1xf32> to vector<8x2xf32>
    %26 = arith.subf %12, %25 : vector<8x2xf32>
    %c0_15 = arith.constant 0 : index
    %c0_16 = arith.constant 0 : index
    %27 = vector.load %arg6[%c0_15, %c0_16] : memref<8x2xf32, #tpu.memory_space<vmem>>, vector<8x2xf32>
    tpu.vector_store %arg6[%c0_15, %c0_16], %26 {strides = array<i32>} : memref<8x2xf32, #tpu.memory_space<vmem>>, vector<8x2xf32>,
    return
  }
  func.func @transform_0(%arg0: i32) -> (i32, i32) {
    %c0_i32 = arith.constant 0 : i32
    %c0_i32_0 = arith.constant 0 : i32
    return %arg0, %c0_i32 : i32, i32
  }
  func.func @transform_1(%arg0: i32) -> (i32, i32) {
    %c0_i32 = arith.constant 0 : i32
    %c0_i32_0 = arith.constant 0 : i32
    %c0_i32_1 = arith.constant 0 : i32
    return %c0_i32, %c0_i32_0 : i32, i32
  }
  func.func @transform_2(%arg0: i32) -> (i32, i32) {
    %c0_i32 = arith.constant 0 : i32
    %c0_i32_0 = arith.constant 0 : i32
    %c0_i32_1 = arith.constant 0 : i32
    return %c0_i32, %c0_i32_0 : i32, i32
  }
  func.func @transform_3(%arg0: i32) -> (i32, i32) {
    %c0_i32 = arith.constant 0 : i32
    %c0_i32_0 = arith.constant 0 : i32
    %c0_i32_1 = arith.constant 0 : i32
    return %c0_i32, %c0_i32_0 : i32, i32
  }
  func.func @transform_4(%arg0: i32) -> (i32, i32) {
    %c0_i32 = arith.constant 0 : i32
    %c0_i32_0 = arith.constant 0 : i32
    %c0_i32_1 = arith.constant 0 : i32
    return %c0_i32, %c0_i32_0 : i32, i32
  }
  func.func @transform_5(%arg0: i32) -> (i32, i32) {
    %c0_i32 = arith.constant 0 : i32
    %c0_i32_0 = arith.constant 0 : i32
    return %arg0, %c0_i32 : i32, i32
  }
}

</mosaic_0001>

<bundles_post_ra>
// kernel: tpu_custom_call.1
= control target key start
LH: loop header
LB: loop body
LE: loop exit
PB: predicated region body
PF: predicated region fallthrough
CT: control target
= control target key end

     0   :  { %10 = vsyncpa [#allocation3], 0  ;;  %s787_s18 = smov 0   ;;  %s916_s0 = inlined_call_operand.vmem [shape: f32[10,256], index: 0, kind: input, shape index: {}]   ;;  %s917_s1 = inlined_call_operand.hbm [shape: f32[256,128], index: 1, kind: input, shape index: {}]   ;;  %s918_s2 = inlined_call_operand.vmem [shape: f32[1,128], index: 2, kind: input, shape index: {}]   ;;  %s919_s3 = inlined_call_operand.vmem [shape: f32[128,2], index: 3, kind: input, shape index: {}]   ;;  %s920_s4 = inlined_call_operand.vmem [shape: f32[1,2], index: 4, kind: input, shape index: {}]   ;;  %s921_s5 = inlined_call_operand.vmem [shape: f32[10,2], index: 5, kind: output, shape index: {}]  }
   0x1 LB: > { %s793_s19 = sadd.s32 4294967295, %s749_s18   ;;  %p527_p0 = scmp.ge.s32.totalorder %s749_s18, 1  ;;  %s749_s18 = sphi %s787_s18, %s16_s18  }
   0x2   : > { %p157_p1 = scmp.lt.s32.totalorder %s749_s18, 3  ;;  %s751_s20 = smov [#allocation2]  }
   0x3   : > { %s169_s21 = sshll.u32 %s751_s20, 4  ;;  %p922_p3 = scmp.eq.s32.totalorder %s793_s19, 0  ;;  %s170_s21 = int_to_ptr.vmem [resolvable:$true] %s169_s21 }
   0x4   : > { %p797_p2 = pnand %p527_p0, %p157_p1  ;;  %s711_s26 = scalar_lea.hbm %s917_s1, 4096 }
   0x5   : > { %p712_p6 = scmp.ne.s32.totalorder %s917_s1, %s711_s26  ;;  %p718_p10 = scmp.lt.u32.totalorder %s711_s26, %s917_s1 }
   0x6   : > { %s924_s22 = scalar_select %p797_p2, 1, 0 }
   0x7   : > { %p687_p4 = pneg %p797_p2 }
   0x9   : > { %p806_p5 = pnand %p922_p3, %p687_p4 }
   0xb   : > { %p713_p7 = pneg %p806_p5 }
   0xd   : > { %p714_p8 = pnand %p713_p7, %p712_p6 }
   0xf   : > { %p715_p9 = pneg %p714_p8 }
  0x11   : > { %p720_p11 = pnand %p718_p10, %p715_p9 }
  0x13   : > { %723 = shalt.err (!%p720_p11)
}
  0x14   : > { %s724_s6 = scalar_lea.vmem %s170_s21, 4096  ;;  %p732_p1 = scmp.lt.s32.totalorder %s170_s21, %s170_s21 }
  0x15   : > { %p725_p12 = scmp.ne.s32.totalorder %s170_s21, %s724_s6  ;;  %p733_p4 = scmp.lt.s32.totalorder %s724_s6, %s724_s6 }
  0x17   : > { %p727_p13 = pnand %p725_p12, %p713_p7  ;;  %p734_p3 = por %p733_p4, %p732_p1 }
  0x19   : > { %p728_p0 = pneg %p727_p13 }
  0x1b   : > { %p735_p2 = pnand %p734_p3, %p728_p0 }
  0x1d   : > { %738 = shalt.err (!%p735_p2)
}
  0x1e   : > { %s752_s7 = smov 128   ;;  %s753_s8 = smov 8  }
  0x1f   : > { %690 = dma.hbm_to_vmem [thread:$0]  (!%p806_p5), %s917_s1, 4096, %s170_s21, [#allocation3], %s752_s7, %s752_s7, %s753_s8  }
  0x20   : > { %p926_p6 = scmp.ne.s32.totalorder %s924_s22, 0 }
  0x21   : > { %p927_p8 = scmp.eq.s32.totalorder (!%p926_p6), %s793_s19, 0 }
  0x22   : > { %202 = sbr.rel (%p926_p6) target bundleno = 692 (0x2b4), region = 40 }
  0x29   : > { %744 = dma.done.wait (%p927_p8), [#allocation3], 4096   ;;  %p928_p7 = pmov %p927_p8 }
  0x2a   : > { %v754_v0 = vmov 0.0|0.0   ;;  %p229_p2 = scmp.lt.s32.totalorder %s793_s19, 1  ;;  %v256_v1 = vld [vmem:[#allocation2 + $0x80] sm:$0xff]  ;;  %v257_v2 = vld [vmem:[#allocation2 + $0x88] sm:$0xff]  ;;  %v258_v6 = vld [vmem:[#allocation2 + $0x90] sm:$0xff]  ;;  %vm755_vm0 = vmmov 0  }
  0x2b   : > { %746 = vsyncadd (%p928_p7), [#allocation3], 4294963200  ;;  %659 = vmatprep.subr.bf16.mxu1 %v754_v0  ;;  %v240_v3 = vld [vmem:[#allocation2] sm:$0xff]  ;;  %v627_v4 = vpack.c.bf16 %v257_v2, %v256_v1  ;;  %v241_v5 = vld [vmem:[#allocation2 + $0x8] sm:$0xff]  ;;  %vm443_vm1 = vcmask 15360  }
  0x2c   : > { %s930_s19 = smov (!%p229_p2, %s793_s19), 1  ;;  %v259_v7 = vld [vmem:[#allocation2 + $0x98] sm:$0xff]  ;;  %v629_v8 = vpack.c.bf16 %v241_v5, %v240_v3  ;;  %v242_v10 = vld [vmem:[#allocation2 + $0x10] sm:$0xff]  ;;  %v260_v12 = vld [vmem:[#allocation2 + $0xa0] sm:$0xff] }
  0x2d   : > { %v631_v9 = vpack.c.bf16 %v259_v7, %v258_v6  ;;  %v243_v11 = vld [vmem:[#allocation2 + $0x18] sm:$0xff]  ;;  %628 = vmatprep.subr.bf16.mxu0 %v627_v4  ;;  %v261_v13 = vld [vmem:[#allocation2 + $0xa8] sm:$0xff]  ;;  %s539_s11 = sshll.u32 %s930_s19, 4  ;;  %v244_v16 = vld [vmem:[#allocation2 + $0x20] sm:$0xff]  ;;  %s534_s30 = sshll.u32 %s930_s19, 3 }
  0x2e   : > { %630 = vmatpush3.bf16.msra.mxu0 %v629_v8  ;;  %v633_v14 = vpack.c.bf16 %v243_v11, %v242_v10  ;;  %v635_v15 = vpack.c.bf16 %v261_v13, %v260_v12  ;;  %v245_v17 = vld [vmem:[#allocation2 + $0x28] sm:$0xff]  ;;  %v262_v18 = vld [vmem:[#allocation2 + $0xb0] sm:$0xff]  ;;  %v263_v19 = vld [vmem:[#allocation2 + $0xb8] sm:$0xff]  ;;  %s841_s14 = scalar_lea.vmem %s916_s0, %s539_s11  ;;  %v756_v12 = vmov 0.0   ;;  %s237_s8 = scalar_lea.vmem %s921_s5, %s534_s30 }
  0x2f   : > { %632 = vmatprep.subr.bf16.mxu0 %v631_v9  ;;  %v637_v20 = vpack.c.bf16 %v245_v17, %v244_v16  ;;  %v639_v21 = vpack.c.bf16 %v263_v19, %v262_v18  ;;  %v246_v22 = vld [vmem:[#allocation2 + $0x30] sm:$0xff]  ;;  %v247_v23 = vld [vmem:[#allocation2 + $0x38] sm:$0xff]  ;;  %v264_v24 = vld [vmem:[#allocation2 + $0xc0] sm:$0xff]  ;;  %624 = vmatprep.mubr.msk.f32.mxu1 %vm755_vm0, %v756_v12 }
  0x30   : > { %v265_v25 = vld [vmem:[#allocation2 + $0xc8] sm:$0xff]  ;;  %v350_v27 = vld [vmem:[%s919_s3] sm:$0xff]  ;;  %v641_v29 = vpack.c.bf16 %v247_v23, %v246_v22  ;;  %v352_v31 = vld [vmem:[%s919_s3 + $0x10] sm:$0xff] }
  0x31   : > { %v239_v26 = vld [vmem:[%s841_s14 + $0x8] sm:$0xff]  ;;  %v353_v32 = vld [vmem:[%s919_s3 + $0x18] sm:$0xff]  ;;  %v643_v33 = vpack.c.bf16 %v265_v25, %v264_v24  ;;  %v248_v34 = vld [vmem:[#allocation2 + $0x40] sm:$0xff] }
  0x32   : > { %634 = vmatpush3.bf16.msra.mxu0 %v633_v14  ;;  %343 = vmatprep.mubr.f32.mxu0 %v239_v26  ;;  %v351_v28 = vld [vmem:[%s919_s3 + $0x8] sm:$0xff]  ;;  %v266_v36 = vld [vmem:[#allocation2 + $0xd0] sm:$0xff]  ;;  %v267_v37 = vld [vmem:[#allocation2 + $0xd8] sm:$0xff]  ;;  %v663_v38 = vpack.c.bf16 %v353_v32, %v352_v31 }
  0x33   : > { %636 = vmatprep.subr.bf16.mxu0 %v635_v15  ;;  %v660_v30 = vpack.c.bf16 %v351_v28, %v350_v27  ;;  %v249_v35 = vld [vmem:[#allocation2 + $0x48] sm:$0xff]  ;;  %v354_v39 = vld [vmem:[%s919_s3 + $0x20] sm:$0xff]  ;;  %v647_v42 = vpack.c.bf16 %v267_v37, %v266_v36  ;;  %v250_v43 = vld [vmem:[#allocation2 + $0x50] sm:$0xff] }
  0x34   : > { %v355_v40 = vld [vmem:[%s919_s3 + $0x28] sm:$0xff]  ;;  %v645_v41 = vpack.c.bf16 %v249_v35, %v248_v34  ;;  %v251_v44 = vld [vmem:[#allocation2 + $0x58] sm:$0xff]  ;;  %v268_v45 = vld [vmem:[#allocation2 + $0xe0] sm:$0xff] }
  0x35   : > { %661 = vmatpush3.bf16.msra.mxu1 %v660_v30  ;;  %v269_v46 = vld [vmem:[#allocation2 + $0xe8] sm:$0xff]  ;;  %v666_v47 = vpack.c.bf16 %v355_v40, %v354_v39  ;;  %v356_v48 = vld [vmem:[%s919_s3 + $0x30] sm:$0xff]  ;;  %v357_v49 = vld [vmem:[%s919_s3 + $0x38] sm:$0xff]  ;;  %v649_v50 = vpack.c.bf16 %v251_v44, %v250_v43 }
  0x36   : > { %638 = vmatpush3.bf16.msra.mxu0 %v637_v20  ;;  %662 = vmatprep.subr.bf16.mxu1 %v754_v0  ;;  %v651_v51 = vpack.c.bf16 %v269_v46, %v268_v45  ;;  %v252_v52 = vld [vmem:[#allocation2 + $0x60] sm:$0xff]  ;;  %v253_v53 = vld [vmem:[#allocation2 + $0x68] sm:$0xff]  ;;  %v270_v54 = vld [vmem:[#allocation2 + $0xf0] sm:$0xff]  ;;  %v669_v56 = vpack.c.bf16 %v357_v49, %v356_v48 }
  0x37   : > { %640 = vmatprep.subr.bf16.mxu0 %v639_v21  ;;  %v271_v55 = vld [vmem:[#allocation2 + $0xf8] sm:$0xff]  ;;  %v358_v57 = vld [vmem:[%s919_s3 + $0x40] sm:$0xff]  ;;  %v359_v58 = vld [vmem:[%s919_s3 + $0x48] sm:$0xff]  ;;  %v653_v59 = vpack.c.bf16 %v253_v53, %v252_v52 }
  0x38   : > { %v655_v60 = vpack.c.bf16 %v271_v55, %v270_v54  ;;  %v254_v61 = vld [vmem:[#allocation2 + $0x70] sm:$0xff]  ;;  %v255_v62 = vld [vmem:[#allocation2 + $0x78] sm:$0xff]  ;;  %v672_v63 = vpack.c.bf16 %v359_v58, %v358_v57  ;;  %v238_v5 = vld [vmem:[%s841_s14] sm:$0xff] }
  0x39   : > { %664 = vmatpush3.bf16.msra.mxu1 %v663_v38  ;;  %v360_v1 = vld [vmem:[%s919_s3 + $0x50] sm:$0xff]  ;;  %v361_v2 = vld [vmem:[%s919_s3 + $0x58] sm:$0xff]  ;;  %v657_v3 = vpack.c.bf16 %v255_v62, %v254_v61  ;;  %v362_v6 = vld [vmem:[%s919_s3 + $0x60] sm:$0xff] }
  0x3a   : > { %642 = vmatpush3.bf16.msra.mxu0 %v641_v29  ;;  %665 = vmatprep.subr.bf16.mxu1 %v754_v0  ;;  %v675_v4 = vpack.c.bf16 %v361_v2, %v360_v1  ;;  %v363_v7 = vld [vmem:[%s919_s3 + $0x68] sm:$0xff]  ;;  %v364_v9 = vld [vmem:[%s919_s3 + $0x70] sm:$0xff]  ;;  %v365_v10 = vld [vmem:[%s919_s3 + $0x78] sm:$0xff] }
  0x3b   : > { %644 = vmatprep.subr.bf16.mxu0 %v643_v33  ;;  %v678_v8 = vpack.c.bf16 %v363_v7, %v362_v6  ;;  %v681_v11 = vpack.c.bf16 %v365_v10, %v364_v9  ;;  %v535_v14 = vld [vmem:[%s918_s2] ss:$0 sm:$0xff] }
  0x3c   : > { %v536_v18 = vld [vmem:[%s920_s4] ss:$0 sm:$0xff] }
  0x3d   : > { %667 = vmatpush3.bf16.msra.mxu1 %v666_v47 }
  0x3e   : > { %646 = vmatpush3.bf16.msra.mxu0 %v645_v41  ;;  %668 = vmatprep.subr.bf16.mxu1 %v754_v0 }
  0x3f   : > { %648 = vmatprep.subr.bf16.mxu0 %v647_v42 }
  0x41   : > { %670 = vmatpush3.bf16.msra.mxu1 %v669_v56 }
  0x42   : > { %650 = vmatpush3.bf16.msra.mxu0 %v649_v50  ;;  %671 = vmatprep.subr.bf16.mxu1 %v754_v0 }
  0x43   : > { %652 = vmatprep.subr.bf16.mxu0 %v651_v51 }
  0x45   : > { %673 = vmatpush3.bf16.msra.mxu1 %v672_v63 }
  0x46   : > { %654 = vmatpush3.bf16.msra.mxu0 %v653_v59  ;;  %674 = vmatprep.subr.bf16.mxu1 %v754_v0 }
  0x47   : > { %656 = vmatprep.subr.bf16.mxu0 %v655_v60 }
  0x49   : > { %676 = vmatpush3.bf16.msra.mxu1 %v675_v4 }
  0x4a   : > { %658 = vmatpush3.bf16.msra.mxu0 %v657_v3  ;;  %677 = vmatprep.subr.bf16.mxu1 %v754_v0 }
  0x4d   : > { %344 = vmatmul.mubr.f32.vlgmr.msra.gmra.mrb[0].mxu0 %v238_v5  ;;  %679 = vmatpush3.bf16.msra.mxu1 %v678_v8 }
  0x4e   : > { %680 = vmatprep.subr.bf16.mxu1 %v754_v0 }
  0x51   : > { %682 = vmatpush3.bf16.msra.mxu1 %v681_v11 }
 0x120   : > { %v572_v13 = vpop.f32.mrb[0].mxu0 }
 0x121   : > { %v573_v15 = vpop.f32.mrb[1].mxu0 }
 0x122   : > { %v574_v0 = vadd.f32 %v573_v15, %v572_v13 }
 0x124   : > { %v346_v16 = vadd.f32 %v574_v0, %v535_v14 }
 0x126   : > { %v349_v17 = vmax.f32 %v346_v16, 0.0 }
 0x128   : > { %625 = vmatmul.mubr.f32.vlgmr.msra.gmra.mrb[0].mxu1 %v349_v17 }
 0x1fb   : > { %v439_v19 = vpop.f32.mrb[0].mxu1 }
 0x1fc   : > { %v440_v20 = vadd.f32 %v536_v18, %v439_v19  ;;  %v626_v21 = vpop.f32.mrb[1].mxu1 }
 0x1fe   : > { %v444_v22 = vsel %vm443_vm1, %v440_v20, -inf  ;;  %v447_v23 = vsel %vm443_vm1, %v440_v20, 0.0 }
 0x1ff   : > { %445 = vmax.xlane.f32.xlu0 %v444_v22 }
 0x203   : > { %448 = vadd.xlane.f32.xlu0 %v447_v23 }
 0x28c   : > { %v446_v24 = vpop.xlane.xlu0 %445 }
 0x28d   : > { %v450_v25 = vmul.f32 2.0, %v446_v24 }
 0x290   : > { %v449_v26 = vpop.xlane.xlu0 %448 }
 0x291   : > { %v451_v27 = vsub.f32 %v449_v26, %v450_v25 }
 0x293   : > { %v452_v28 = vmul.f32 1.442695, %v451_v27 }
 0x295   : > { %707 = vpow2.f32 %v452_v28 }
 0x29f   : > { %v708_v29 = vpop.eup %707 }
 0x2a0   : > { %v454_v30 = vadd.f32 1.0, %v708_v29 }
 0x2a2   : > { %709 = vlog2.f32 %v454_v30 }
 0x2ac   : > { %v710_v31 = vpop.eup %709 }
 0x2ad   : > { %v456_v32 = vmul.f32 0.6931472, %v710_v31 }
 0x2af   : > { %v457_v33 = vadd.f32 %v456_v32, %v446_v24 }
 0x2b1   : > { %v458_v34 = vsub.f32 %v440_v20, %v457_v33 }
 0x2b3   : > { %459 = vst.msk [vmem:[%s237_s8] sm:$0xff] %vm443_vm1, %v458_v34 }
 0x2b4 PF: > { %s16_s18 = sadd.s32 1, %s749_s18  }
 0x2b5   : > { %p13_p3 = scmp.ge.s32.totalorder %s16_s18, 4  }
 0x2b7   :  { %15 = sbr.rel (!%p13_p3) target bundleno = 1 (0x1), region = 75 }
 0x2be   :  { %479 = vsyncpa [#allocation3], 1 }
 0x2bf   :  { %481 = vsyncpa [#allocation3 + $0x1], 1 }

// kernel: tpu_custom_call.1
= control target key start
LH: loop header
LB: loop body
LE: loop exit
PB: predicated region body
PF: predicated region fallthrough
CT: control target
= control target key end

     0   :  { %10 = vsyncpa [#allocation3], 0  ;;  %s787_s18 = smov 0   ;;  %s916_s0 = inlined_call_operand.vmem [shape: f32[10,256], index: 0, kind: input, shape index: {}]   ;;  %s917_s1 = inlined_call_operand.hbm [shape: f32[256,128], index: 1, kind: input, shape index: {}]   ;;  %s918_s2 = inlined_call_operand.vmem [shape: f32[1,128], index: 2, kind: input, shape index: {}]   ;;  %s919_s3 = inlined_call_operand.vmem [shape: f32[128,2], index: 3, kind: input, shape index: {}]   ;;  %s920_s4 = inlined_call_operand.vmem [shape: f32[1,2], index: 4, kind: input, shape index: {}]   ;;  %s921_s5 = inlined_call_operand.vmem [shape: f32[10,2], index: 5, kind: output, shape index: {}]  }
   0x1 LB: > { %s793_s19 = sadd.s32 4294967295, %s749_s18   ;;  %p527_p0 = scmp.ge.s32.totalorder %s749_s18, 1  ;;  %s749_s18 = sphi %s787_s18, %s16_s18  }
   0x2   : > { %p157_p1 = scmp.lt.s32.totalorder %s749_s18, 3  ;;  %s751_s20 = smov [#allocation2]  }
   0x3   : > { %s169_s21 = sshll.u32 %s751_s20, 4  ;;  %p922_p3 = scmp.eq.s32.totalorder %s793_s19, 0  ;;  %s170_s21 = int_to_ptr.vmem [resolvable:$true] %s169_s21 }
   0x4   : > { %p797_p2 = pnand %p527_p0, %p157_p1  ;;  %s711_s26 = scalar_lea.hbm %s917_s1, 4096 }
   0x5   : > { %p712_p6 = scmp.ne.s32.totalorder %s917_s1, %s711_s26  ;;  %p718_p10 = scmp.lt.u32.totalorder %s711_s26, %s917_s1 }
   0x6   : > { %s924_s22 = scalar_select %p797_p2, 1, 0 }
   0x7   : > { %p687_p4 = pneg %p797_p2 }
   0x9   : > { %p806_p5 = pnand %p922_p3, %p687_p4 }
   0xb   : > { %p713_p7 = pneg %p806_p5 }
   0xd   : > { %p714_p8 = pnand %p713_p7, %p712_p6 }
   0xf   : > { %p715_p9 = pneg %p714_p8 }
  0x11   : > { %p720_p11 = pnand %p718_p10, %p715_p9 }
  0x13   : > { %723 = shalt.err (!%p720_p11)
}
  0x14   : > { %s724_s6 = scalar_lea.vmem %s170_s21, 4096  ;;  %p732_p1 = scmp.lt.s32.totalorder %s170_s21, %s170_s21 }
  0x15   : > { %p725_p12 = scmp.ne.s32.totalorder %s170_s21, %s724_s6  ;;  %p733_p4 = scmp.lt.s32.totalorder %s724_s6, %s724_s6 }
  0x17   : > { %p727_p13 = pnand %p725_p12, %p713_p7  ;;  %p734_p3 = por %p733_p4, %p732_p1 }
  0x19   : > { %p728_p0 = pneg %p727_p13 }
  0x1b   : > { %p735_p2 = pnand %p734_p3, %p728_p0 }
  0x1d   : > { %738 = shalt.err (!%p735_p2)
}
  0x1e   : > { %s752_s7 = smov 128   ;;  %s753_s8 = smov 8  }
  0x1f   : > { %690 = dma.hbm_to_vmem [thread:$0]  (!%p806_p5), %s917_s1, 4096, %s170_s21, [#allocation3], %s752_s7, %s752_s7, %s753_s8  }
  0x20   : > { %p926_p6 = scmp.ne.s32.totalorder %s924_s22, 0 }
  0x21   : > { %p927_p8 = scmp.eq.s32.totalorder (!%p926_p6), %s793_s19, 0 }
  0x22   : > { %202 = sbr.rel (%p926_p6) target bundleno = 692 (0x2b4), region = 40 }
  0x29   : > { %744 = dma.done.wait (%p927_p8), [#allocation3], 4096   ;;  %p928_p7 = pmov %p927_p8 }
  0x2a   : > { %v754_v0 = vmov 0.0|0.0   ;;  %p229_p2 = scmp.lt.s32.totalorder %s793_s19, 1  ;;  %v256_v1 = vld [vmem:[#allocation2 + $0x80] sm:$0xff]  ;;  %v257_v2 = vld [vmem:[#allocation2 + $0x88] sm:$0xff]  ;;  %v258_v6 = vld [vmem:[#allocation2 + $0x90] sm:$0xff]  ;;  %vm755_vm0 = vmmov 0  }
  0x2b   : > { %746 = vsyncadd (%p928_p7), [#allocation3], 4294963200  ;;  %659 = vmatprep.subr.bf16.mxu1 %v754_v0  ;;  %v240_v3 = vld [vmem:[#allocation2] sm:$0xff]  ;;  %v627_v4 = vpack.c.bf16 %v257_v2, %v256_v1  ;;  %v241_v5 = vld [vmem:[#allocation2 + $0x8] sm:$0xff]  ;;  %vm443_vm1 = vcmask 15360  }
  0x2c   : > { %s930_s19 = smov (!%p229_p2, %s793_s19), 1  ;;  %v259_v7 = vld [vmem:[#allocation2 + $0x98] sm:$0xff]  ;;  %v629_v8 = vpack.c.bf16 %v241_v5, %v240_v3  ;;  %v242_v10 = vld [vmem:[#allocation2 + $0x10] sm:$0xff]  ;;  %v260_v12 = vld [vmem:[#allocation2 + $0xa0] sm:$0xff] }
  0x2d   : > { %v631_v9 = vpack.c.bf16 %v259_v7, %v258_v6  ;;  %v243_v11 = vld [vmem:[#allocation2 + $0x18] sm:$0xff]  ;;  %628 = vmatprep.subr.bf16.mxu0 %v627_v4  ;;  %v261_v13 = vld [vmem:[#allocation2 + $0xa8] sm:$0xff]  ;;  %s539_s11 = sshll.u32 %s930_s19, 4  ;;  %v244_v16 = vld [vmem:[#allocation2 + $0x20] sm:$0xff]  ;;  %s534_s30 = sshll.u32 %s930_s19, 3 }
  0x2e   : > { %630 = vmatpush3.bf16.msra.mxu0 %v629_v8  ;;  %v633_v14 = vpack.c.bf16 %v243_v11, %v242_v10  ;;  %v635_v15 = vpack.c.bf16 %v261_v13, %v260_v12  ;;  %v245_v17 = vld [vmem:[#allocation2 + $0x28] sm:$0xff]  ;;  %v262_v18 = vld [vmem:[#allocation2 + $0xb0] sm:$0xff]  ;;  %v263_v19 = vld [vmem:[#allocation2 + $0xb8] sm:$0xff]  ;;  %s841_s14 = scalar_lea.vmem %s916_s0, %s539_s11  ;;  %v756_v12 = vmov 0.0   ;;  %s237_s8 = scalar_lea.vmem %s921_s5, %s534_s30 }
  0x2f   : > { %632 = vmatprep.subr.bf16.mxu0 %v631_v9  ;;  %v637_v20 = vpack.c.bf16 %v245_v17, %v244_v16  ;;  %v639_v21 = vpack.c.bf16 %v263_v19, %v262_v18  ;;  %v246_v22 = vld [vmem:[#allocation2 + $0x30] sm:$0xff]  ;;  %v247_v23 = vld [vmem:[#allocation2 + $0x38] sm:$0xff]  ;;  %v264_v24 = vld [vmem:[#allocation2 + $0xc0] sm:$0xff]  ;;  %624 = vmatprep.mubr.msk.f32.mxu1 %vm755_vm0, %v756_v12 }
  0x30   : > { %v265_v25 = vld [vmem:[#allocation2 + $0xc8] sm:$0xff]  ;;  %v350_v27 = vld [vmem:[%s919_s3] sm:$0xff]  ;;  %v641_v29 = vpack.c.bf16 %v247_v23, %v246_v22  ;;  %v352_v31 = vld [vmem:[%s919_s3 + $0x10] sm:$0xff] }
  0x31   : > { %v239_v26 = vld [vmem:[%s841_s14 + $0x8] sm:$0xff]  ;;  %v353_v32 = vld [vmem:[%s919_s3 + $0x18] sm:$0xff]  ;;  %v643_v33 = vpack.c.bf16 %v265_v25, %v264_v24  ;;  %v248_v34 = vld [vmem:[#allocation2 + $0x40] sm:$0xff] }
  0x32   : > { %634 = vmatpush3.bf16.msra.mxu0 %v633_v14  ;;  %343 = vmatprep.mubr.f32.mxu0 %v239_v26  ;;  %v351_v28 = vld [vmem:[%s919_s3 + $0x8] sm:$0xff]  ;;  %v266_v36 = vld [vmem:[#allocation2 + $0xd0] sm:$0xff]  ;;  %v267_v37 = vld [vmem:[#allocation2 + $0xd8] sm:$0xff]  ;;  %v663_v38 = vpack.c.bf16 %v353_v32, %v352_v31 }
  0x33   : > { %636 = vmatprep.subr.bf16.mxu0 %v635_v15  ;;  %v660_v30 = vpack.c.bf16 %v351_v28, %v350_v27  ;;  %v249_v35 = vld [vmem:[#allocation2 + $0x48] sm:$0xff]  ;;  %v354_v39 = vld [vmem:[%s919_s3 + $0x20] sm:$0xff]  ;;  %v647_v42 = vpack.c.bf16 %v267_v37, %v266_v36  ;;  %v250_v43 = vld [vmem:[#allocation2 + $0x50] sm:$0xff] }
  0x34   : > { %v355_v40 = vld [vmem:[%s919_s3 + $0x28] sm:$0xff]  ;;  %v645_v41 = vpack.c.bf16 %v249_v35, %v248_v34  ;;  %v251_v44 = vld [vmem:[#allocation2 + $0x58] sm:$0xff]  ;;  %v268_v45 = vld [vmem:[#allocation2 + $0xe0] sm:$0xff] }
  0x35   : > { %661 = vmatpush3.bf16.msra.mxu1 %v660_v30  ;;  %v269_v46 = vld [vmem:[#allocation2 + $0xe8] sm:$0xff]  ;;  %v666_v47 = vpack.c.bf16 %v355_v40, %v354_v39  ;;  %v356_v48 = vld [vmem:[%s919_s3 + $0x30] sm:$0xff]  ;;  %v357_v49 = vld [vmem:[%s919_s3 + $0x38] sm:$0xff]  ;;  %v649_v50 = vpack.c.bf16 %v251_v44, %v250_v43 }
  0x36   : > { %638 = vmatpush3.bf16.msra.mxu0 %v637_v20  ;;  %662 = vmatprep.subr.bf16.mxu1 %v754_v0  ;;  %v651_v51 = vpack.c.bf16 %v269_v46, %v268_v45  ;;  %v252_v52 = vld [vmem:[#allocation2 + $0x60] sm:$0xff]  ;;  %v253_v53 = vld [vmem:[#allocation2 + $0x68] sm:$0xff]  ;;  %v270_v54 = vld [vmem:[#allocation2 + $0xf0] sm:$0xff]  ;;  %v669_v56 = vpack.c.bf16 %v357_v49, %v356_v48 }
  0x37   : > { %640 = vmatprep.subr.bf16.mxu0 %v639_v21  ;;  %v271_v55 = vld [vmem:[#allocation2 + $0xf8] sm:$0xff]  ;;  %v358_v57 = vld [vmem:[%s919_s3 + $0x40] sm:$0xff]  ;;  %v359_v58 = vld [vmem:[%s919_s3 + $0x48] sm:$0xff]  ;;  %v653_v59 = vpack.c.bf16 %v253_v53, %v252_v52 }
  0x38   : > { %v655_v60 = vpack.c.bf16 %v271_v55, %v270_v54  ;;  %v254_v61 = vld [vmem:[#allocation2 + $0x70] sm:$0xff]  ;;  %v255_v62 = vld [vmem:[#allocation2 + $0x78] sm:$0xff]  ;;  %v672_v63 = vpack.c.bf16 %v359_v58, %v358_v57  ;;  %v238_v5 = vld [vmem:[%s841_s14] sm:$0xff] }
  0x39   : > { %664 = vmatpush3.bf16.msra.mxu1 %v663_v38  ;;  %v360_v1 = vld [vmem:[%s919_s3 + $0x50] sm:$0xff]  ;;  %v361_v2 = vld [vmem:[%s919_s3 + $0x58] sm:$0xff]  ;;  %v657_v3 = vpack.c.bf16 %v255_v62, %v254_v61  ;;  %v362_v6 = vld [vmem:[%s919_s3 + $0x60] sm:$0xff] }
  0x3a   : > { %642 = vmatpush3.bf16.msra.mxu0 %v641_v29  ;;  %665 = vmatprep.subr.bf16.mxu1 %v754_v0  ;;  %v675_v4 = vpack.c.bf16 %v361_v2, %v360_v1  ;;  %v363_v7 = vld [vmem:[%s919_s3 + $0x68] sm:$0xff]  ;;  %v364_v9 = vld [vmem:[%s919_s3 + $0x70] sm:$0xff]  ;;  %v365_v10 = vld [vmem:[%s919_s3 + $0x78] sm:$0xff] }
  0x3b   : > { %644 = vmatprep.subr.bf16.mxu0 %v643_v33  ;;  %v678_v8 = vpack.c.bf16 %v363_v7, %v362_v6  ;;  %v681_v11 = vpack.c.bf16 %v365_v10, %v364_v9  ;;  %v535_v14 = vld [vmem:[%s918_s2] ss:$0 sm:$0xff] }
  0x3c   : > { %v536_v18 = vld [vmem:[%s920_s4] ss:$0 sm:$0xff] }
  0x3d   : > { %667 = vmatpush3.bf16.msra.mxu1 %v666_v47 }
  0x3e   : > { %646 = vmatpush3.bf16.msra.mxu0 %v645_v41  ;;  %668 = vmatprep.subr.bf16.mxu1 %v754_v0 }
  0x3f   : > { %648 = vmatprep.subr.bf16.mxu0 %v647_v42 }
  0x41   : > { %670 = vmatpush3.bf16.msra.mxu1 %v669_v56 }
  0x42   : > { %650 = vmatpush3.bf16.msra.mxu0 %v649_v50  ;;  %671 = vmatprep.subr.bf16.mxu1 %v754_v0 }
  0x43   : > { %652 = vmatprep.subr.bf16.mxu0 %v651_v51 }
  0x45   : > { %673 = vmatpush3.bf16.msra.mxu1 %v672_v63 }
  0x46   : > { %654 = vmatpush3.bf16.msra.mxu0 %v653_v59  ;;  %674 = vmatprep.subr.bf16.mxu1 %v754_v0 }
  0x47   : > { %656 = vmatprep.subr.bf16.mxu0 %v655_v60 }
  0x49   : > { %676 = vmatpush3.bf16.msra.mxu1 %v675_v4 }
  0x4a   : > { %658 = vmatpush3.bf16.msra.mxu0 %v657_v3  ;;  %677 = vmatprep.subr.bf16.mxu1 %v754_v0 }
  0x4d   : > { %344 = vmatmul.mubr.f32.vlgmr.msra.gmra.mrb[0].mxu0 %v238_v5  ;;  %679 = vmatpush3.bf16.msra.mxu1 %v678_v8 }
  0x4e   : > { %680 = vmatprep.subr.bf16.mxu1 %v754_v0 }
  0x51   : > { %682 = vmatpush3.bf16.msra.mxu1 %v681_v11 }
 0x120   : > { %v572_v13 = vpop.f32.mrb[0].mxu0 }
 0x121   : > { %v573_v15 = vpop.f32.mrb[1].mxu0 }
 0x122   : > { %v574_v0 = vadd.f32 %v573_v15, %v572_v13 }
 0x124   : > { %v346_v16 = vadd.f32 %v574_v0, %v535_v14 }
 0x126   : > { %v349_v17 = vmax.f32 %v346_v16, 0.0 }
 0x128   : > { %625 = vmatmul.mubr.f32.vlgmr.msra.gmra.mrb[0].mxu1 %v349_v17 }
 0x1fb   : > { %v439_v19 = vpop.f32.mrb[0].mxu1 }
 0x1fc   : > { %v440_v20 = vadd.f32 %v536_v18, %v439_v19  ;;  %v626_v21 = vpop.f32.mrb[1].mxu1 }
 0x1fe   : > { %v444_v22 = vsel %vm443_vm1, %v440_v20, -inf  ;;  %v447_v23 = vsel %vm443_vm1, %v440_v20, 0.0 }
 0x1ff   : > { %445 = vmax.xlane.f32.xlu0 %v444_v22 }
 0x203   : > { %448 = vadd.xlane.f32.xlu0 %v447_v23 }
 0x28c   : > { %v446_v24 = vpop.xlane.xlu0 %445 }
 0x28d   : > { %v450_v25 = vmul.f32 2.0, %v446_v24 }
 0x290   : > { %v449_v26 = vpop.xlane.xlu0 %448 }
 0x291   : > { %v451_v27 = vsub.f32 %v449_v26, %v450_v25 }
 0x293   : > { %v452_v28 = vmul.f32 1.442695, %v451_v27 }
 0x295   : > { %707 = vpow2.f32 %v452_v28 }
 0x29f   : > { %v708_v29 = vpop.eup %707 }
 0x2a0   : > { %v454_v30 = vadd.f32 1.0, %v708_v29 }
 0x2a2   : > { %709 = vlog2.f32 %v454_v30 }
 0x2ac   : > { %v710_v31 = vpop.eup %709 }
 0x2ad   : > { %v456_v32 = vmul.f32 0.6931472, %v710_v31 }
 0x2af   : > { %v457_v33 = vadd.f32 %v456_v32, %v446_v24 }
 0x2b1   : > { %v458_v34 = vsub.f32 %v440_v20, %v457_v33 }
 0x2b3   : > { %459 = vst.msk [vmem:[%s237_s8] sm:$0xff] %vm443_vm1, %v458_v34 }
 0x2b4 PF: > { %s16_s18 = sadd.s32 1, %s749_s18  }
 0x2b5   : > { %p13_p3 = scmp.ge.s32.totalorder %s16_s18, 4  }
 0x2b7   :  { %15 = sbr.rel (!%p13_p3) target bundleno = 1 (0x1), region = 75 }
 0x2be   :  { %479 = vsyncpa [#allocation3], 1 }
 0x2bf   :  { %481 = vsyncpa [#allocation3 + $0x1], 1 }

</bundles_post_ra>
